<compile_context>
chip_gen: v7x
topology: tpu7x:2x2x1
jax: 0.10.0
libtpu: 0.0.40
codegen_flags: <defaults>
</compile_context>

<pallas_src>
import functools

import jax
import jax.numpy as jnp
import numpy as np
from jax.experimental import pallas as pl
from jax.experimental.pallas import tpu as pltpu


def _round_up(x, m):
    return (x + m - 1) // m * m


def _next_pow2(x):
    return 1 << max(int(x) - 1, 0).bit_length()


def _vmem_budget_bytes():
    """Generation-aware VMEM budget (v7x: 64 MiB/TC, v5e/v6e: 128 MiB)."""
    cap = 64 * 1024 * 1024
    try:
        cap = int(getattr(pltpu.get_tpu_info(), "vmem_capacity_bytes", cap))
    except Exception:
        pass
    return min(int(cap * 0.70), 100 * 1024 * 1024)


# ----------------------------------------------------------------------------
# Kernels
# ----------------------------------------------------------------------------
def _tap_conv_kernel(xa_ref, xb_ref, w_ref, b_ref, o_ref, xs_ref, acc_ref, *,
                     taps, wp, tm, tb, kw, mxu_dtype):
    """Halo'd conv: grid = (M row-blocks,).

    xa_ref: main (tm, Cin) block of the flattened padded activation.
    xb_ref: (tb, Cin) halo block (the next tb rows).
    w_ref:  resident folded weight (KH*KW, Cin, Cout_p).
    """
    # Assemble the contiguous row slab [main | halo] once per grid step.
    xs_ref[pl.ds(0, tm), :] = xa_ref[...].astype(jnp.float32)
    xs_ref[pl.ds(tm, tb), :] = xb_ref[...].astype(jnp.float32)

    for t in range(taps):          # static unroll over KH*KW taps
        di, dj = divmod(t, kw)
        off = di * wp + dj         # static row shift for this tap
        lhs = xs_ref[pl.ds(off, tm), :].astype(mxu_dtype)
        contrib = jnp.dot(lhs, w_ref[t], preferred_element_type=jnp.float32)
        if t == 0:
            acc_ref[...] = contrib
        else:
            acc_ref[...] += contrib

    o_ref[...] = (acc_ref[...] + b_ref[...]).astype(o_ref.dtype)


def _im2col_conv_kernel(p_ref, w_ref, b_ref, o_ref):
    """Small-Cin path: one full-K matmul + bias per (M, Cout) tile."""
    o_ref[...] = (
        jnp.dot(p_ref[...], w_ref[...], preferred_element_type=jnp.float32)
        + b_ref[...]
    ).astype(o_ref.dtype)


# ----------------------------------------------------------------------------
# Wrapper
# ----------------------------------------------------------------------------
@functools.partial(jax.jit, static_argnames=("tile_m", "compute_dtype"))
def lora_conv2d(x, conv_w, conv_b, lora_left_w, lora_right_w, alpha=16,
                tile_m=1024, compute_dtype=jnp.bfloat16):
    """x: NCHW.  conv_w: [Cout, Cin, KH, KW] (odd KH/KW, SAME, bias).
    lora_left_w: [rank, Cin, 1, 1].  lora_right_w: [Cout, rank, 1, 1]."""
    N, Cin, H, W = x.shape
    Cout, _, KH, KW = conv_w.shape
    rank = lora_left_w.shape[0]
    if KH % 2 != 1 or KW % 2 != 1:
        raise ValueError("only odd kernel sizes (SAME padding) are supported")

    T = KH * KW
    ph, pw = KH // 2, KW // 2
    Hp, Wp = H + KH - 1, W + KW - 1
    out_dtype = x.dtype
    csize = jnp.dtype(compute_dtype).itemsize
    osize = jnp.dtype(out_dtype).itemsize
    budget = _vmem_budget_bytes()

    # ---- fold LoRA into the conv weight (centre tap += alpha * Wr @ Wl) ----
    wl2 = lora_left_w.reshape(rank, Cin)           # [rank, Cin]
    wr2 = lora_right_w.reshape(Cout, rank)         # [Cout, rank]
    w_fold = conv_w.at[:, :, KH // 2, KW // 2].add(alpha * (wr2 @ wl2))

    # ---- lane-dense output padding (review: pad whenever Cout >= 32) ----
    Cout_p = Cout
    if Cout >= 32 and Cout % 128 != 0:
        Cout_p = _round_up(Cout, 128)
    bias = conv_b.reshape(1, Cout).astype(jnp.float32)
    if Cout_p != Cout:
        bias = jnp.pad(bias, ((0, 0), (0, Cout_p - Cout)))

    # ---- padded NHWC activation (channels on the lane axis) ----
    x_nhwc = x.transpose(0, 2, 3, 1).astype(compute_dtype)      # [N,H,W,Cin]
    x_pad = jnp.pad(x_nhwc, ((0, 0), (ph, ph), (pw, pw), (0, 0)))

    # ======================= tap path (Cin >= 128) =========================
    use_tap_path = Cin >= 128
    if use_tap_path:
        R = N * Hp * Wp                              # flattened padded rows
        HALO = (KH - 1) * Wp + (KW - 1)              # max static row shift
        tb = max(8, _next_pow2(HALO))                # halo block rows
        tm = min(int(tile_m), max(tb, _next_pow2(R) // 2))  # >=2 grid steps
        tm = max(tb, tm // tb * tb)                  # tb | tm

        def _tap_bytes(tm_):
            return (2 * tm_ * Cin * csize            # main blocks (double buf)
                    + 2 * tb * Cin * csize           # halo blocks
                    + (tm_ + tb) * Cin * 4           # f32 row slab
                    + 2 * T * Cin * Cout_p * csize   # resident weight
                    + 2 * Cout_p * 4                 # bias
                    + 2 * tm_ * Cout_p * osize       # output blocks
                    + tm_ * Cout_p * 4)              # f32 accumulator

        while _tap_bytes(tm) > budget and tm > tb:
            tm = max(tb, (tm // 2) // tb * tb)
        if _tap_bytes(tm) > budget:
            use_tap_path = False                     # weight slab too big

    if use_tap_path:
        Rp = _round_up(R, tm)
        x_flat = x_pad.reshape(R, Cin)
        x_flat = jnp.pad(x_flat, ((0, Rp + tb - R), (0, 0)))

        # taps-major resident weight [KH*KW, Cin, Cout_p]
        w_taps = w_fold.transpose(2, 3, 1, 0).reshape(T, Cin, Cout)
        w_taps = w_taps.astype(compute_dtype)
        if Cout_p != Cout:
            w_taps = jnp.pad(w_taps, ((0, 0), (0, 0), (0, Cout_p - Cout)))

        grid = (Rp // tm,)
        step_b = tm // tb
        kernel = functools.partial(
            _tap_conv_kernel, taps=T, wp=Wp, tm=tm, tb=tb, kw=KW,
            mxu_dtype=compute_dtype)
        cost = pl.CostEstimate(
            flops=int(2 * Rp * Cin * Cout_p * T),
            transcendentals=0,
            bytes_accessed=int((Rp + tb) * Cin * csize          # main stream
                               + grid[0] * tb * Cin * csize     # halo re-read
                               + T * Cin * Cout_p * csize       # weight (1x)
                               + Cout_p * 4
                               + Rp * Cout_p * osize))

        out_flat = pl.pallas_call(
            kernel,
            out_shape=jax.ShapeDtypeStruct((Rp, Cout_p), out_dtype),
            grid_spec=pltpu.PrefetchScalarGridSpec(
                num_scalar_prefetch=0,
                grid=grid,
                in_specs=[
                    pl.BlockSpec((tm, Cin), lambda i: (i, 0)),          # main
                    pl.BlockSpec((tb, Cin),
                                 lambda i: ((i + 1) * step_b, 0)),      # halo
                    pl.BlockSpec((T, Cin, Cout_p),
                                 lambda i: (0, 0, 0)),                  # weight
                    pl.BlockSpec((1, Cout_p), lambda i: (0, 0)),        # bias
                ],
                out_specs=pl.BlockSpec((tm, Cout_p), lambda i: (i, 0)),
                scratch_shapes=[
                    pltpu.VMEM((tm + tb, Cin), jnp.float32),   # row slab
                    pltpu.VMEM((tm, Cout_p), jnp.float32),     # accumulator
                ],
            ),
            compiler_params=pltpu.CompilerParams(
                dimension_semantics=("parallel",),
                vmem_limit_bytes=int(budget)),
            cost_estimate=cost,
        )(x_flat, x_flat, w_taps, bias)

        out = out_flat[:R].reshape(N, Hp, Wp, Cout_p)[:, :H, :W, :Cout]
        return out.transpose(0, 3, 1, 2).astype(x.dtype)

    # ===================== im2col path (small Cin) ==========================
    M = N * H * W
    K = Cin * T
    # tap-major K (lane-friendly concat, matches weight transpose below)
    taps_list = [x_pad[:, i:i + H, j:j + W, :]
                 for i in range(KH) for j in range(KW)]
    patches = jnp.concatenate(taps_list, axis=-1).reshape(M, K)

    wc = w_fold.transpose(0, 2, 3, 1).reshape(Cout, K).T.astype(compute_dtype)
    if Cout_p != Cout:
        wc = jnp.pad(wc, ((0, 0), (0, Cout_p - Cout)))

    if Cout_p <= 512:
        tn = Cout_p
    elif Cout_p % 256 == 0:
        tn = 256
    else:
        tn = 128

    tm = min(int(tile_m), _round_up(M, 8))

    def _col_bytes(tm_):
        return (2 * tm_ * K * csize + 2 * K * tn * csize + 2 * Cout_p * 4
                + 2 * tm_ * tn * osize)

    while _col_bytes(tm) > budget and tm > 256:
        tm = _round_up(tm // 2, 8)

    Mp = _round_up(M, tm)
    if Mp != M:
        patches = jnp.pad(patches, ((0, Mp - M), (0, 0)))
    grid = (Mp // tm, Cout_p // tn)

    w_reads = 1 if grid[1] == 1 else grid[0] * grid[1]
    cost = pl.CostEstimate(
        flops=int(2 * Mp * K * Cout_p),
        transcendentals=0,
        bytes_accessed=int(Mp * K * csize
                           + w_reads * K * tn * csize
                           + Cout_p * 4
                           + Mp * Cout_p * osize))

    out_flat = pl.pallas_call(
        _im2col_conv_kernel,
        out_shape=jax.ShapeDtypeStruct((Mp, Cout_p), out_dtype),
        grid_spec=pltpu.PrefetchScalarGridSpec(
            num_scalar_prefetch=0,
            grid=grid,
            in_specs=[
                pl.BlockSpec((tm, K), lambda i, j: (i, 0)),    # patches
                pl.BlockSpec((K, tn), lambda i, j: (0, j)),    # folded weight
                pl.BlockSpec((1, tn), lambda i, j: (0, j)),    # bias
            ],
            out_specs=pl.BlockSpec((tm, tn), lambda i, j: (i, j)),
        ),
        compiler_params=pltpu.CompilerParams(
            dimension_semantics=("parallel", "parallel"),
            vmem_limit_bytes=int(budget)),
        cost_estimate=cost,
    )(patches, wc, bias)

    out = out_flat[:M, :Cout].reshape(N, H, W, Cout).transpose(0, 3, 1, 2)
    return out.astype(x.dtype)


# ----------------------------------------------------------------------------
# Reference + demo
# ----------------------------------------------------------------------------
def _reference(x, conv_w, conv_b, lora_left_w, lora_right_w, alpha=16):
    dn = jax.lax.conv_dimension_numbers(x.shape, conv_w.shape,
                                        ("NCHW", "OIHW", "NCHW"))
    out = jax.lax.conv_general_dilated(x, conv_w, (1, 1), "SAME",
                                       dimension_numbers=dn)
    out = out + conv_b[None, :, None, None]
    mid = jax.lax.conv_general_dilated(x, lora_left_w, (1, 1), "VALID",
                                       dimension_numbers=dn)
    res = jax.lax.conv_general_dilated(mid, lora_right_w, (1, 1), "VALID",
                                       dimension_numbers=dn)
    return out + res * alpha


def _make_inputs(key, N, Cin, H, W, Cout, rank, kh=3, kw=3):
    kx, kwc, kb, kl, kr = jax.random.split(key, 5)
    x = jax.random.normal(kx, (N, Cin, H, W), jnp.float32)
    fan_in = Cin * kh * kw
    bound = 1.0 / np.sqrt(fan_in)
    conv_w = jax.random.uniform(kwc, (Cout, Cin, kh, kw), jnp.float32,
                                -bound, bound)
    conv_b = jax.random.uniform(kb, (Cout,), jnp.float32, -bound, bound)
    # The module zero-inits LoRA weights; use nonzero values so the folded
    # LoRA path is actually exercised numerically.
    lora_left_w = 0.05 * jax.random.normal(kl, (rank, Cin, 1, 1), jnp.float32)
    lora_right_w = 0.05 * jax.random.normal(kr, (Cout, rank, 1, 1), jnp.float32)
    return x, conv_w, conv_b, lora_left_w, lora_right_w


if __name__ == "__main__":
    key = jax.random.PRNGKey(0)
    alpha = 16

    configs = [
        # --- im2col path (Cin < 128) ---
        (dict(N=2, Cin=4, H=16, W=16, Cout=8, rank=4), jnp.float32, 1e-3, 1e-3),
        (dict(N=2, Cin=4, H=16, W=16, Cout=8, rank=4), jnp.bfloat16, 1e-1, 5e-2),
        # ragged M (M = 288)
        (dict(N=2, Cin=4, H=12, W=12, Cout=8, rank=4), jnp.float32, 1e-3, 1e-3),
        # lane-dense Cout padding (64 -> 128)
        (dict(N=2, Cin=4, H=16, W=16, Cout=64, rank=4), jnp.float32, 1e-3, 1e-3),
        # --- halo/tap path (Cin >= 128): no im2col, resident weight ---
        (dict(N=2, Cin=128, H=16, W=16, Cout=128, rank=4), jnp.float32, 3e-3, 3e-3),
        (dict(N=2, Cin=128, H=16, W=16, Cout=128, rank=4), jnp.bfloat16, 2e-1, 5e-2),
    ]

    for cfg, cdt, atol, rtol in configs:
        key, sub = jax.random.split(key)
        args = _make_inputs(sub, **cfg)
        out = lora_conv2d(*args, alpha=alpha, compute_dtype=cdt)
        out = jax.block_until_ready(out)
        ref = _reference(*args, alpha=alpha)
        assert out.shape == ref.shape, (out.shape, ref.shape)
        assert jnp.allclose(out, ref, atol=atol, rtol=rtol), (
            f"mismatch vs reference for {cfg}, compute_dtype={cdt}")

    print("KERNEL_OK")
</pallas_src>

<mosaic_0001>
module attributes {stable_mosaic.version = 11 : i64} {
  func.func @_im2col_conv_kernel(%arg0: i32, %arg1: i32, %arg2: memref<512x36xf32, #tpu.memory_space<vmem>>, %arg3: memref<36x8xf32, #tpu.memory_space<vmem>>, %arg4: memref<1x8xf32, #tpu.memory_space<vmem>>, %arg5: memref<512x8xf32, #tpu.memory_space<vmem>>) attributes {dimension_semantics = [#tpu.dimension_semantics<parallel>, #tpu.dimension_semantics<parallel>], iteration_bounds = array<i64: 1, 1>, scalar_prefetch = 0 : i64, scratch_operands = 0 : i64, tpu.core_type = #tpu.core_type<tc>, window_params = [{transform_indices = @transform_0, window_bounds = array<i64: 512, 36>}, {transform_indices = @transform_1, window_bounds = array<i64: 36, 8>}, {transform_indices = @transform_2, window_bounds = array<i64: 1, 8>}, {transform_indices = @transform_3, window_bounds = array<i64: 512, 8>}]} {
    %c0 = arith.constant 0 : index
    %c0_0 = arith.constant 0 : index
    %0 = vector.load %arg2[%c0, %c0_0] : memref<512x36xf32, #tpu.memory_space<vmem>>, vector<512x36xf32>
    %c0_1 = arith.constant 0 : index
    %c0_2 = arith.constant 0 : index
    %1 = vector.load %arg3[%c0_1, %c0_2] : memref<36x8xf32, #tpu.memory_space<vmem>>, vector<36x8xf32>
    %cst = arith.constant dense<0.000000e+00> : vector<512x8xf32>
    %2 = tpu.matmul %0, %1, %cst {dimension_numbers = #tpu.dot_dimension_numbers<[1], [0], [0], [1], [0, 0, 1, 1], [], []>} : vector<512x36xf32>, vector<36x8xf32>, vector<512x8xf32> -> vector<512x8xf32>
    %c0_3 = arith.constant 0 : index
    %c0_4 = arith.constant 0 : index
    %3 = vector.load %arg4[%c0_3, %c0_4] : memref<1x8xf32, #tpu.memory_space<vmem>>, vector<1x8xf32>
    %4 = vector.broadcast %3 : vector<1x8xf32> to vector<512x8xf32>
    %5 = arith.addf %2, %4 : vector<512x8xf32>
    %c0_5 = arith.constant 0 : index
    %c0_6 = arith.constant 0 : index
    %6 = vector.load %arg5[%c0_5, %c0_6] : memref<512x8xf32, #tpu.memory_space<vmem>>, vector<512x8xf32>
    tpu.vector_store %arg5[%c0_5, %c0_6], %5 {strides = array<i32>} : memref<512x8xf32, #tpu.memory_space<vmem>>, vector<512x8xf32>,
    return
  }
  func.func @transform_0(%arg0: i32, %arg1: i32) -> (i32, i32) {
    %c0_i32 = arith.constant 0 : i32
    %c0_i32_0 = arith.constant 0 : i32
    return %arg0, %c0_i32 : i32, i32
  }
  func.func @transform_1(%arg0: i32, %arg1: i32) -> (i32, i32) {
    %c0_i32 = arith.constant 0 : i32
    %c0_i32_0 = arith.constant 0 : i32
    return %c0_i32, %arg1 : i32, i32
  }
  func.func @transform_2(%arg0: i32, %arg1: i32) -> (i32, i32) {
    %c0_i32 = arith.constant 0 : i32
    %c0_i32_0 = arith.constant 0 : i32
    return %c0_i32, %arg1 : i32, i32
  }
  func.func @transform_3(%arg0: i32, %arg1: i32) -> (i32, i32) {
    %c0_i32 = arith.constant 0 : i32
    return %arg0, %arg1 : i32, i32
  }
}

</mosaic_0001>

<bundles_post_ra>
// kernel: lora_conv2d.1
= control target key start
LH: loop header
LB: loop body
LE: loop exit
PB: predicated region body
PF: predicated region fallthrough
CT: control target
= control target key end

     0   :  { %vm90_vm0 = vcmask 293888   ;;  %vm283_vm1 = vcmask 1043456   ;;  %vm672_vm2 = vcmask 64512   ;;  %s1612_s1 = inlined_call_operand.vmem [shape: f32[36,8], index: 1, kind: input, shape index: {}]   ;;  %s1613_s0 = inlined_call_operand.vmem [shape: f32[512,36], index: 0, kind: input, shape index: {}]   ;;  %s1614_s2 = inlined_call_operand.vmem [shape: f32[1,8], index: 2, kind: input, shape index: {}]   ;;  %s1615_s3 = inlined_call_operand.vmem [shape: f32[512,8], index: 3, kind: output, shape index: {}]  }
   0x1   :  { %v78_v0 = vld [vmem:[%s1612_s1] sm:$0xff]  ;;  %v79_v1 = vld [vmem:[%s1612_s1 + $0x8] sm:$0xff]  ;;  %v80_v2 = vld [vmem:[%s1612_s1 + $0x10] sm:$0xff] }
   0x2   :  { %v982_v3 = vpack.c.bf16 %v79_v1, %v78_v0  ;;  %v81_v4 = vld [vmem:[%s1612_s1 + $0x18] sm:$0xff]  ;;  %v14_v5 = vld [vmem:[%s1613_s0] sm:$0xff]  ;;  %v15_v9 = vld [vmem:[%s1613_s0 + $0x8] sm:$0xff] }
   0x3   :  { %v986_v6 = vpack.c.bf16 %v81_v4, %v80_v2  ;;  %886 = vmatprep.mubr.msk.f32.mxu0 %vm90_vm0, %v14_v5  ;;  %v46_v7 = vld [vmem:[%s1613_s0 + $0x100] sm:$0xff]  ;;  %v47_v10 = vld [vmem:[%s1613_s0 + $0x108] sm:$0xff]  ;;  %v16_v11 = vld [vmem:[%s1613_s0 + $0x10] sm:$0xff] }
   0x4   :  { %983 = vmatprep.subr.bf16.mxu0 %v982_v3  ;;  %990 = vmatprep.subr.bf16.mxu1 %v982_v3  ;;  %v82_v8 = vld [vmem:[%s1612_s1 + $0x20] sm:$0xf]  ;;  %v48_v12 = vld [vmem:[%s1613_s0 + $0x110] sm:$0xff]  ;;  %v17_v13 = vld [vmem:[%s1613_s0 + $0x18] sm:$0xff] }
   0x5   :  { %985 = vmatpush3.bf16.msra.mxu0 %v982_v3  ;;  %993 = vmatpush3.bf16.msra.mxu1 %v982_v3  ;;  %v49_v14 = vld [vmem:[%s1613_s0 + $0x118] sm:$0xff]  ;;  %v18_v15 = vld [vmem:[%s1613_s0 + $0x20] sm:$0xff]  ;;  %v19_v17 = vld [vmem:[%s1613_s0 + $0x28] sm:$0xff] }
   0x6   :  { %987 = vmatprep.subr.bf16.mxu0 %v986_v6  ;;  %991 = vmatprep.subr.bf16.mxu1 %v986_v6  ;;  %v50_v16 = vld [vmem:[%s1613_s0 + $0x120] sm:$0xff]  ;;  %v51_v18 = vld [vmem:[%s1613_s0 + $0x128] sm:$0xff]  ;;  %v20_v19 = vld [vmem:[%s1613_s0 + $0x30] sm:$0xff] }
   0x7   :  { %934 = vmatprep.mubr.msk.f32.mxu1 %vm90_vm0, %v46_v7  ;;  %v52_v20 = vld [vmem:[%s1613_s0 + $0x130] sm:$0xff]  ;;  %v21_v21 = vld [vmem:[%s1613_s0 + $0x38] sm:$0xff]  ;;  %v22_v23 = vld [vmem:[%s1613_s0 + $0x40] sm:$0xff] }
   0x8   :  { %v53_v22 = vld [vmem:[%s1613_s0 + $0x138] sm:$0xff]  ;;  %v54_v24 = vld [vmem:[%s1613_s0 + $0x140] sm:$0xff]  ;;  %v23_v25 = vld [vmem:[%s1613_s0 + $0x48] sm:$0xff] }
   0x9   :  { %989 = vmatpush3.bf16.msra.mxu0 %v986_v6  ;;  %994 = vmatpush3.bf16.msra.mxu1 %v986_v6  ;;  %v55_v26 = vld [vmem:[%s1613_s0 + $0x148] sm:$0xff]  ;;  %v24_v27 = vld [vmem:[%s1613_s0 + $0x50] sm:$0xff]  ;;  %v25_v29 = vld [vmem:[%s1613_s0 + $0x58] sm:$0xff] }
   0xa   :  { %884 = vmatprep.subr.msk.mxu0 %vm283_vm1, %v82_v8  ;;  %992 = vmatprep.subr.msk.mxu1 %vm283_vm1, %v82_v8  ;;  %v56_v28 = vld [vmem:[%s1613_s0 + $0x150] sm:$0xff]  ;;  %v57_v30 = vld [vmem:[%s1613_s0 + $0x158] sm:$0xff]  ;;  %v26_v31 = vld [vmem:[%s1613_s0 + $0x60] sm:$0xff] }
   0xb   :  { %v58_v32 = vld [vmem:[%s1613_s0 + $0x160] sm:$0xff]  ;;  %v27_v33 = vld [vmem:[%s1613_s0 + $0x68] sm:$0xff]  ;;  %v28_v35 = vld [vmem:[%s1613_s0 + $0x70] sm:$0xff] }
   0xc   :  { %v59_v34 = vld [vmem:[%s1613_s0 + $0x168] sm:$0xff]  ;;  %v60_v36 = vld [vmem:[%s1613_s0 + $0x170] sm:$0xff]  ;;  %v29_v37 = vld [vmem:[%s1613_s0 + $0x78] sm:$0xff] }
   0xd   :  { %885 = vmatpush3.msk.msra.mxu0 %vm283_vm1, %v82_v8  ;;  %995 = vmatpush3.msk.msra.mxu1 %vm283_vm1, %v82_v8  ;;  %v61_v38 = vld [vmem:[%s1613_s0 + $0x178] sm:$0xff]  ;;  %v30_v39 = vld [vmem:[%s1613_s0 + $0x80] sm:$0xff]  ;;  %v31_v41 = vld [vmem:[%s1613_s0 + $0x88] sm:$0xff] }
   0xe   :  { %887 = vmatmul.mubr.msk.f32.vlgmr.msra.gmra.mrb[0].mxu0 %vm90_vm0, %v15_v9  ;;  %935 = vmatmul.mubr.msk.f32.vlgmr.msra.gmra.mrb[0].mxu1 %vm90_vm0, %v47_v10  ;;  %v62_v40 = vld [vmem:[%s1613_s0 + $0x180] sm:$0xff]  ;;  %v63_v42 = vld [vmem:[%s1613_s0 + $0x188] sm:$0xff]  ;;  %v32_v43 = vld [vmem:[%s1613_s0 + $0x90] sm:$0xff] }
   0xf   :  { %889 = vmatprep.mubr.msk.f32.mxu0 %vm90_vm0, %v16_v11  ;;  %937 = vmatprep.mubr.msk.f32.mxu1 %vm90_vm0, %v48_v12  ;;  %v64_v44 = vld [vmem:[%s1613_s0 + $0x190] sm:$0xff]  ;;  %v33_v45 = vld [vmem:[%s1613_s0 + $0x98] sm:$0xff]  ;;  %v34_v47 = vld [vmem:[%s1613_s0 + $0xa0] sm:$0xff] }
  0x10   :  { %v65_v46 = vld [vmem:[%s1613_s0 + $0x198] sm:$0xff]  ;;  %v66_v48 = vld [vmem:[%s1613_s0 + $0x1a0] sm:$0xff]  ;;  %v35_v49 = vld [vmem:[%s1613_s0 + $0xa8] sm:$0xff] }
  0x11   :  { %v67_v50 = vld [vmem:[%s1613_s0 + $0x1a8] sm:$0xff]  ;;  %v36_v51 = vld [vmem:[%s1613_s0 + $0xb0] sm:$0xff]  ;;  %v37_v53 = vld [vmem:[%s1613_s0 + $0xb8] sm:$0xff] }
  0x12   :  { %890 = vmatmul.mubr.msk.f32.gmra.mrb[2].mxu0 %vm90_vm0, %v17_v13  ;;  %938 = vmatmul.mubr.msk.f32.gmra.mrb[2].mxu1 %vm90_vm0, %v49_v14  ;;  %v68_v52 = vld [vmem:[%s1613_s0 + $0x1b0] sm:$0xff]  ;;  %v69_v54 = vld [vmem:[%s1613_s0 + $0x1b8] sm:$0xff]  ;;  %v38_v55 = vld [vmem:[%s1613_s0 + $0xc0] sm:$0xff] }
  0x13   :  { %892 = vmatprep.mubr.msk.f32.mxu0 %vm90_vm0, %v18_v15  ;;  %940 = vmatprep.mubr.msk.f32.mxu1 %vm90_vm0, %v50_v16  ;;  %v70_v56 = vld [vmem:[%s1613_s0 + $0x1c0] sm:$0xff]  ;;  %v39_v57 = vld [vmem:[%s1613_s0 + $0xc8] sm:$0xff]  ;;  %v40_v59 = vld [vmem:[%s1613_s0 + $0xd0] sm:$0xff] }
  0x14   :  { %v71_v58 = vld [vmem:[%s1613_s0 + $0x1c8] sm:$0xff]  ;;  %v72_v60 = vld [vmem:[%s1613_s0 + $0x1d0] sm:$0xff]  ;;  %v41_v61 = vld [vmem:[%s1613_s0 + $0xd8] sm:$0xff] }
  0x15   :  { %v73_v62 = vld [vmem:[%s1613_s0 + $0x1d8] sm:$0xff]  ;;  %v42_v63 = vld [vmem:[%s1613_s0 + $0xe0] sm:$0xff]  ;;  %v43_v1 = vld [vmem:[%s1613_s0 + $0xe8] sm:$0xff] }
  0x16   :  { %893 = vmatmul.mubr.msk.f32.gmra.mrb[4].mxu0 %vm90_vm0, %v19_v17  ;;  %941 = vmatmul.mubr.msk.f32.gmra.mrb[4].mxu1 %vm90_vm0, %v51_v18  ;;  %v74_v0 = vld [vmem:[%s1613_s0 + $0x1e0] sm:$0xff]  ;;  %v75_v2 = vld [vmem:[%s1613_s0 + $0x1e8] sm:$0xff]  ;;  %v44_v3 = vld [vmem:[%s1613_s0 + $0xf0] sm:$0xff] }
  0x17   :  { %895 = vmatprep.mubr.msk.f32.mxu0 %vm90_vm0, %v20_v19  ;;  %943 = vmatprep.mubr.msk.f32.mxu1 %vm90_vm0, %v52_v20  ;;  %v76_v4 = vld [vmem:[%s1613_s0 + $0x1f0] sm:$0xff]  ;;  %v45_v5 = vld [vmem:[%s1613_s0 + $0xf8] sm:$0xff]  ;;  %v1290_v7 = vld [vmem:[%s1614_s2] ss:$0 sm:$0xff] }
  0x18   :  { %v77_v6 = vld [vmem:[%s1613_s0 + $0x1f8] sm:$0xff] }
  0x1a   :  { %896 = vmatmul.mubr.msk.f32.gmra.mrb[6].mxu0 %vm90_vm0, %v21_v21  ;;  %944 = vmatmul.mubr.msk.f32.gmra.mrb[6].mxu1 %vm90_vm0, %v53_v22 }
  0x1b   :  { %898 = vmatprep.mubr.msk.f32.mxu0 %vm90_vm0, %v22_v23  ;;  %946 = vmatprep.mubr.msk.f32.mxu1 %vm90_vm0, %v54_v24 }
  0x1e   :  { %899 = vmatmul.mubr.msk.f32.gmra.mrb[8].mxu0 %vm90_vm0, %v23_v25  ;;  %947 = vmatmul.mubr.msk.f32.gmra.mrb[8].mxu1 %vm90_vm0, %v55_v26 }
  0x1f   :  { %901 = vmatprep.mubr.msk.f32.mxu0 %vm90_vm0, %v24_v27  ;;  %949 = vmatprep.mubr.msk.f32.mxu1 %vm90_vm0, %v56_v28 }
  0x22   :  { %902 = vmatmul.mubr.msk.f32.gmra.mrb[10].mxu0 %vm90_vm0, %v25_v29  ;;  %950 = vmatmul.mubr.msk.f32.gmra.mrb[10].mxu1 %vm90_vm0, %v57_v30 }
  0x23   :  { %904 = vmatprep.mubr.msk.f32.mxu0 %vm90_vm0, %v26_v31  ;;  %952 = vmatprep.mubr.msk.f32.mxu1 %vm90_vm0, %v58_v32 }
  0x26   :  { %905 = vmatmul.mubr.msk.f32.gmra.mrb[12].mxu0 %vm90_vm0, %v27_v33  ;;  %953 = vmatmul.mubr.msk.f32.gmra.mrb[12].mxu1 %vm90_vm0, %v59_v34 }
  0x27   :  { %907 = vmatprep.mubr.msk.f32.mxu0 %vm90_vm0, %v28_v35  ;;  %955 = vmatprep.mubr.msk.f32.mxu1 %vm90_vm0, %v60_v36 }
  0x2a   :  { %908 = vmatmul.mubr.msk.f32.gmra.mrb[14].mxu0 %vm90_vm0, %v29_v37  ;;  %956 = vmatmul.mubr.msk.f32.gmra.mrb[14].mxu1 %vm90_vm0, %v61_v38 }
  0x2b   :  { %910 = vmatprep.mubr.msk.f32.mxu0 %vm90_vm0, %v30_v39  ;;  %958 = vmatprep.mubr.msk.f32.mxu1 %vm90_vm0, %v62_v40 }
  0x2e   :  { %911 = vmatmul.mubr.msk.f32.gmra.mrb[16].mxu0 %vm90_vm0, %v31_v41  ;;  %959 = vmatmul.mubr.msk.f32.gmra.mrb[16].mxu1 %vm90_vm0, %v63_v42 }
  0x2f   :  { %913 = vmatprep.mubr.msk.f32.mxu0 %vm90_vm0, %v32_v43  ;;  %961 = vmatprep.mubr.msk.f32.mxu1 %vm90_vm0, %v64_v44 }
  0x32   :  { %914 = vmatmul.mubr.msk.f32.gmra.mrb[18].mxu0 %vm90_vm0, %v33_v45  ;;  %962 = vmatmul.mubr.msk.f32.gmra.mrb[18].mxu1 %vm90_vm0, %v65_v46 }
  0x33   :  { %916 = vmatprep.mubr.msk.f32.mxu0 %vm90_vm0, %v34_v47  ;;  %964 = vmatprep.mubr.msk.f32.mxu1 %vm90_vm0, %v66_v48 }
  0x36   :  { %917 = vmatmul.mubr.msk.f32.gmra.mrb[20].mxu0 %vm90_vm0, %v35_v49  ;;  %965 = vmatmul.mubr.msk.f32.gmra.mrb[20].mxu1 %vm90_vm0, %v67_v50 }
  0x37   :  { %919 = vmatprep.mubr.msk.f32.mxu0 %vm90_vm0, %v36_v51  ;;  %967 = vmatprep.mubr.msk.f32.mxu1 %vm90_vm0, %v68_v52 }
  0x3a   :  { %920 = vmatmul.mubr.msk.f32.gmra.mrb[22].mxu0 %vm90_vm0, %v37_v53  ;;  %968 = vmatmul.mubr.msk.f32.gmra.mrb[22].mxu1 %vm90_vm0, %v69_v54 }
  0x3b   :  { %922 = vmatprep.mubr.msk.f32.mxu0 %vm90_vm0, %v38_v55  ;;  %970 = vmatprep.mubr.msk.f32.mxu1 %vm90_vm0, %v70_v56 }
  0x3e   :  { %923 = vmatmul.mubr.msk.f32.gmra.mrb[24].mxu0 %vm90_vm0, %v39_v57  ;;  %971 = vmatmul.mubr.msk.f32.gmra.mrb[24].mxu1 %vm90_vm0, %v71_v58 }
  0x3f   :  { %925 = vmatprep.mubr.msk.f32.mxu0 %vm90_vm0, %v40_v59  ;;  %973 = vmatprep.mubr.msk.f32.mxu1 %vm90_vm0, %v72_v60 }
  0x42   :  { %926 = vmatmul.mubr.msk.f32.gmra.mrb[26].mxu0 %vm90_vm0, %v41_v61  ;;  %974 = vmatmul.mubr.msk.f32.gmra.mrb[26].mxu1 %vm90_vm0, %v73_v62 }
  0x43   :  { %928 = vmatprep.mubr.msk.f32.mxu0 %vm90_vm0, %v42_v63  ;;  %976 = vmatprep.mubr.msk.f32.mxu1 %vm90_vm0, %v74_v0 }
  0x46   :  { %929 = vmatmul.mubr.msk.f32.gmra.mrb[28].mxu0 %vm90_vm0, %v43_v1  ;;  %977 = vmatmul.mubr.msk.f32.gmra.mrb[28].mxu1 %vm90_vm0, %v75_v2 }
  0x47   :  { %931 = vmatprep.mubr.msk.f32.mxu0 %vm90_vm0, %v44_v3  ;;  %979 = vmatprep.mubr.msk.f32.mxu1 %vm90_vm0, %v76_v4 }
  0x4a   :  { %932 = vmatmul.mubr.msk.f32.gmra.mrb[30].mxu0 %vm90_vm0, %v45_v5  ;;  %980 = vmatmul.mubr.msk.f32.gmra.mrb[30].mxu1 %vm90_vm0, %v77_v6 }
  0xe1   :  { %v888_v8 = vpop.f32.mrb[0].mxu0  ;;  %v936_v9 = vpop.f32.mrb[0].mxu1 }
  0xe2   :  { %v359_v10 = vadd.f32 %v888_v8, %v1290_v7  ;;  %v519_v11 = vadd.f32 %v936_v9, %v1290_v7  ;;  %v353_v12 = vpop.f32.mrb[1].mxu0  ;;  %v513_v13 = vpop.f32.mrb[1].mxu1 }
  0xe3   :  { %v354_v14 = vadd.f32 %v1290_v7, %v353_v12  ;;  %v514_v15 = vadd.f32 %v1290_v7, %v513_v13 }
  0xe4   :  { %674 = vst.msk [vmem:[%s1615_s3 + $0x8] sm:$0xff] %vm672_vm2, %v359_v10  ;;  %706 = vst.msk [vmem:[%s1615_s3 + $0x108] sm:$0xff] %vm672_vm2, %v519_v11 }
  0xe5   :  { %673 = vst.msk [vmem:[%s1615_s3] sm:$0xff] %vm672_vm2, %v354_v14  ;;  %705 = vst.msk [vmem:[%s1615_s3 + $0x100] sm:$0xff] %vm672_vm2, %v514_v15  ;;  %v891_v16 = vpop.f32.mrb[2].mxu0  ;;  %v939_v17 = vpop.f32.mrb[2].mxu1 }
  0xe6   :  { %v369_v18 = vadd.f32 %v891_v16, %v1290_v7  ;;  %v529_v19 = vadd.f32 %v939_v17, %v1290_v7  ;;  %v363_v20 = vpop.f32.mrb[3].mxu0  ;;  %v523_v21 = vpop.f32.mrb[3].mxu1 }
  0xe7   :  { %v364_v22 = vadd.f32 %v1290_v7, %v363_v20  ;;  %v524_v23 = vadd.f32 %v1290_v7, %v523_v21 }
  0xe8   :  { %676 = vst.msk [vmem:[%s1615_s3 + $0x18] sm:$0xff] %vm672_vm2, %v369_v18  ;;  %708 = vst.msk [vmem:[%s1615_s3 + $0x118] sm:$0xff] %vm672_vm2, %v529_v19 }
  0xe9   :  { %675 = vst.msk [vmem:[%s1615_s3 + $0x10] sm:$0xff] %vm672_vm2, %v364_v22  ;;  %707 = vst.msk [vmem:[%s1615_s3 + $0x110] sm:$0xff] %vm672_vm2, %v524_v23  ;;  %v894_v24 = vpop.f32.mrb[4].mxu0  ;;  %v942_v25 = vpop.f32.mrb[4].mxu1 }
  0xea   :  { %v379_v26 = vadd.f32 %v894_v24, %v1290_v7  ;;  %v539_v27 = vadd.f32 %v942_v25, %v1290_v7  ;;  %v373_v28 = vpop.f32.mrb[5].mxu0  ;;  %v533_v29 = vpop.f32.mrb[5].mxu1 }
  0xeb   :  { %v374_v30 = vadd.f32 %v1290_v7, %v373_v28  ;;  %v534_v31 = vadd.f32 %v1290_v7, %v533_v29 }
  0xec   :  { %678 = vst.msk [vmem:[%s1615_s3 + $0x28] sm:$0xff] %vm672_vm2, %v379_v26  ;;  %710 = vst.msk [vmem:[%s1615_s3 + $0x128] sm:$0xff] %vm672_vm2, %v539_v27 }
  0xed   :  { %677 = vst.msk [vmem:[%s1615_s3 + $0x20] sm:$0xff] %vm672_vm2, %v374_v30  ;;  %709 = vst.msk [vmem:[%s1615_s3 + $0x120] sm:$0xff] %vm672_vm2, %v534_v31  ;;  %v897_v32 = vpop.f32.mrb[6].mxu0  ;;  %v945_v33 = vpop.f32.mrb[6].mxu1 }
  0xee   :  { %v389_v34 = vadd.f32 %v897_v32, %v1290_v7  ;;  %v549_v35 = vadd.f32 %v945_v33, %v1290_v7  ;;  %v383_v36 = vpop.f32.mrb[7].mxu0  ;;  %v543_v37 = vpop.f32.mrb[7].mxu1 }
  0xef   :  { %v384_v38 = vadd.f32 %v1290_v7, %v383_v36  ;;  %v544_v39 = vadd.f32 %v1290_v7, %v543_v37 }
  0xf0   :  { %680 = vst.msk [vmem:[%s1615_s3 + $0x38] sm:$0xff] %vm672_vm2, %v389_v34  ;;  %712 = vst.msk [vmem:[%s1615_s3 + $0x138] sm:$0xff] %vm672_vm2, %v549_v35 }
  0xf1   :  { %679 = vst.msk [vmem:[%s1615_s3 + $0x30] sm:$0xff] %vm672_vm2, %v384_v38  ;;  %711 = vst.msk [vmem:[%s1615_s3 + $0x130] sm:$0xff] %vm672_vm2, %v544_v39  ;;  %v900_v40 = vpop.f32.mrb[8].mxu0  ;;  %v948_v41 = vpop.f32.mrb[8].mxu1 }
  0xf2   :  { %v399_v42 = vadd.f32 %v900_v40, %v1290_v7  ;;  %v559_v43 = vadd.f32 %v948_v41, %v1290_v7  ;;  %v393_v44 = vpop.f32.mrb[9].mxu0  ;;  %v553_v45 = vpop.f32.mrb[9].mxu1 }
  0xf3   :  { %v394_v46 = vadd.f32 %v1290_v7, %v393_v44  ;;  %v554_v47 = vadd.f32 %v1290_v7, %v553_v45 }
  0xf4   :  { %682 = vst.msk [vmem:[%s1615_s3 + $0x48] sm:$0xff] %vm672_vm2, %v399_v42  ;;  %714 = vst.msk [vmem:[%s1615_s3 + $0x148] sm:$0xff] %vm672_vm2, %v559_v43 }
  0xf5   :  { %681 = vst.msk [vmem:[%s1615_s3 + $0x40] sm:$0xff] %vm672_vm2, %v394_v46  ;;  %713 = vst.msk [vmem:[%s1615_s3 + $0x140] sm:$0xff] %vm672_vm2, %v554_v47  ;;  %v903_v48 = vpop.f32.mrb[10].mxu0  ;;  %v951_v49 = vpop.f32.mrb[10].mxu1 }
  0xf6   :  { %v409_v50 = vadd.f32 %v903_v48, %v1290_v7  ;;  %v569_v51 = vadd.f32 %v951_v49, %v1290_v7  ;;  %v403_v52 = vpop.f32.mrb[11].mxu0  ;;  %v563_v53 = vpop.f32.mrb[11].mxu1 }
  0xf7   :  { %v404_v54 = vadd.f32 %v1290_v7, %v403_v52  ;;  %v564_v55 = vadd.f32 %v1290_v7, %v563_v53 }
  0xf8   :  { %684 = vst.msk [vmem:[%s1615_s3 + $0x58] sm:$0xff] %vm672_vm2, %v409_v50  ;;  %716 = vst.msk [vmem:[%s1615_s3 + $0x158] sm:$0xff] %vm672_vm2, %v569_v51 }
  0xf9   :  { %683 = vst.msk [vmem:[%s1615_s3 + $0x50] sm:$0xff] %vm672_vm2, %v404_v54  ;;  %715 = vst.msk [vmem:[%s1615_s3 + $0x150] sm:$0xff] %vm672_vm2, %v564_v55  ;;  %v906_v56 = vpop.f32.mrb[12].mxu0  ;;  %v954_v57 = vpop.f32.mrb[12].mxu1 }
  0xfa   :  { %v419_v58 = vadd.f32 %v906_v56, %v1290_v7  ;;  %v579_v59 = vadd.f32 %v954_v57, %v1290_v7  ;;  %v413_v60 = vpop.f32.mrb[13].mxu0  ;;  %v573_v61 = vpop.f32.mrb[13].mxu1 }
  0xfb   :  { %v414_v62 = vadd.f32 %v1290_v7, %v413_v60  ;;  %v574_v63 = vadd.f32 %v1290_v7, %v573_v61 }
  0xfc   :  { %686 = vst.msk [vmem:[%s1615_s3 + $0x68] sm:$0xff] %vm672_vm2, %v419_v58  ;;  %718 = vst.msk [vmem:[%s1615_s3 + $0x168] sm:$0xff] %vm672_vm2, %v579_v59 }
  0xfd   :  { %685 = vst.msk [vmem:[%s1615_s3 + $0x60] sm:$0xff] %vm672_vm2, %v414_v62  ;;  %717 = vst.msk [vmem:[%s1615_s3 + $0x160] sm:$0xff] %vm672_vm2, %v574_v63  ;;  %v909_v0 = vpop.f32.mrb[14].mxu0  ;;  %v957_v1 = vpop.f32.mrb[14].mxu1 }
  0xfe   :  { %v429_v2 = vadd.f32 %v909_v0, %v1290_v7  ;;  %v589_v3 = vadd.f32 %v957_v1, %v1290_v7  ;;  %v423_v4 = vpop.f32.mrb[15].mxu0  ;;  %v583_v5 = vpop.f32.mrb[15].mxu1 }
  0xff   :  { %v424_v6 = vadd.f32 %v1290_v7, %v423_v4  ;;  %v584_v8 = vadd.f32 %v1290_v7, %v583_v5 }
 0x100   :  { %688 = vst.msk [vmem:[%s1615_s3 + $0x78] sm:$0xff] %vm672_vm2, %v429_v2  ;;  %720 = vst.msk [vmem:[%s1615_s3 + $0x178] sm:$0xff] %vm672_vm2, %v589_v3 }
 0x101   :  { %687 = vst.msk [vmem:[%s1615_s3 + $0x70] sm:$0xff] %vm672_vm2, %v424_v6  ;;  %719 = vst.msk [vmem:[%s1615_s3 + $0x170] sm:$0xff] %vm672_vm2, %v584_v8  ;;  %v912_v9 = vpop.f32.mrb[16].mxu0  ;;  %v960_v10 = vpop.f32.mrb[16].mxu1 }
 0x102   :  { %v439_v11 = vadd.f32 %v912_v9, %v1290_v7  ;;  %v599_v12 = vadd.f32 %v960_v10, %v1290_v7  ;;  %v433_v13 = vpop.f32.mrb[17].mxu0  ;;  %v593_v14 = vpop.f32.mrb[17].mxu1 }
 0x103   :  { %v434_v15 = vadd.f32 %v1290_v7, %v433_v13  ;;  %v594_v16 = vadd.f32 %v1290_v7, %v593_v14 }
 0x104   :  { %690 = vst.msk [vmem:[%s1615_s3 + $0x88] sm:$0xff] %vm672_vm2, %v439_v11  ;;  %722 = vst.msk [vmem:[%s1615_s3 + $0x188] sm:$0xff] %vm672_vm2, %v599_v12 }
 0x105   :  { %689 = vst.msk [vmem:[%s1615_s3 + $0x80] sm:$0xff] %vm672_vm2, %v434_v15  ;;  %721 = vst.msk [vmem:[%s1615_s3 + $0x180] sm:$0xff] %vm672_vm2, %v594_v16  ;;  %v915_v17 = vpop.f32.mrb[18].mxu0  ;;  %v963_v18 = vpop.f32.mrb[18].mxu1 }
 0x106   :  { %v449_v19 = vadd.f32 %v915_v17, %v1290_v7  ;;  %v609_v20 = vadd.f32 %v963_v18, %v1290_v7  ;;  %v443_v21 = vpop.f32.mrb[19].mxu0  ;;  %v603_v22 = vpop.f32.mrb[19].mxu1 }
 0x107   :  { %v444_v23 = vadd.f32 %v1290_v7, %v443_v21  ;;  %v604_v24 = vadd.f32 %v1290_v7, %v603_v22 }
 0x108   :  { %692 = vst.msk [vmem:[%s1615_s3 + $0x98] sm:$0xff] %vm672_vm2, %v449_v19  ;;  %724 = vst.msk [vmem:[%s1615_s3 + $0x198] sm:$0xff] %vm672_vm2, %v609_v20 }
 0x109   :  { %691 = vst.msk [vmem:[%s1615_s3 + $0x90] sm:$0xff] %vm672_vm2, %v444_v23  ;;  %723 = vst.msk [vmem:[%s1615_s3 + $0x190] sm:$0xff] %vm672_vm2, %v604_v24  ;;  %v918_v25 = vpop.f32.mrb[20].mxu0  ;;  %v966_v26 = vpop.f32.mrb[20].mxu1 }
 0x10a   :  { %v459_v27 = vadd.f32 %v918_v25, %v1290_v7  ;;  %v619_v28 = vadd.f32 %v966_v26, %v1290_v7  ;;  %v453_v29 = vpop.f32.mrb[21].mxu0  ;;  %v613_v30 = vpop.f32.mrb[21].mxu1 }
 0x10b   :  { %v454_v31 = vadd.f32 %v1290_v7, %v453_v29  ;;  %v614_v32 = vadd.f32 %v1290_v7, %v613_v30 }
 0x10c   :  { %694 = vst.msk [vmem:[%s1615_s3 + $0xa8] sm:$0xff] %vm672_vm2, %v459_v27  ;;  %726 = vst.msk [vmem:[%s1615_s3 + $0x1a8] sm:$0xff] %vm672_vm2, %v619_v28 }
 0x10d   :  { %693 = vst.msk [vmem:[%s1615_s3 + $0xa0] sm:$0xff] %vm672_vm2, %v454_v31  ;;  %725 = vst.msk [vmem:[%s1615_s3 + $0x1a0] sm:$0xff] %vm672_vm2, %v614_v32  ;;  %v921_v33 = vpop.f32.mrb[22].mxu0  ;;  %v969_v34 = vpop.f32.mrb[22].mxu1 }
 0x10e   :  { %v469_v35 = vadd.f32 %v921_v33, %v1290_v7  ;;  %v629_v36 = vadd.f32 %v969_v34, %v1290_v7  ;;  %v463_v37 = vpop.f32.mrb[23].mxu0  ;;  %v623_v38 = vpop.f32.mrb[23].mxu1 }
 0x10f   :  { %v464_v39 = vadd.f32 %v1290_v7, %v463_v37  ;;  %v624_v40 = vadd.f32 %v1290_v7, %v623_v38 }
 0x110   :  { %696 = vst.msk [vmem:[%s1615_s3 + $0xb8] sm:$0xff] %vm672_vm2, %v469_v35  ;;  %728 = vst.msk [vmem:[%s1615_s3 + $0x1b8] sm:$0xff] %vm672_vm2, %v629_v36 }
 0x111   :  { %695 = vst.msk [vmem:[%s1615_s3 + $0xb0] sm:$0xff] %vm672_vm2, %v464_v39  ;;  %727 = vst.msk [vmem:[%s1615_s3 + $0x1b0] sm:$0xff] %vm672_vm2, %v624_v40  ;;  %v924_v41 = vpop.f32.mrb[24].mxu0  ;;  %v972_v42 = vpop.f32.mrb[24].mxu1 }
 0x112   :  { %v479_v43 = vadd.f32 %v924_v41, %v1290_v7  ;;  %v639_v44 = vadd.f32 %v972_v42, %v1290_v7  ;;  %v473_v45 = vpop.f32.mrb[25].mxu0  ;;  %v633_v46 = vpop.f32.mrb[25].mxu1 }
 0x113   :  { %v474_v47 = vadd.f32 %v1290_v7, %v473_v45  ;;  %v634_v48 = vadd.f32 %v1290_v7, %v633_v46 }
 0x114   :  { %698 = vst.msk [vmem:[%s1615_s3 + $0xc8] sm:$0xff] %vm672_vm2, %v479_v43  ;;  %730 = vst.msk [vmem:[%s1615_s3 + $0x1c8] sm:$0xff] %vm672_vm2, %v639_v44 }
 0x115   :  { %697 = vst.msk [vmem:[%s1615_s3 + $0xc0] sm:$0xff] %vm672_vm2, %v474_v47  ;;  %729 = vst.msk [vmem:[%s1615_s3 + $0x1c0] sm:$0xff] %vm672_vm2, %v634_v48  ;;  %v927_v49 = vpop.f32.mrb[26].mxu0  ;;  %v975_v50 = vpop.f32.mrb[26].mxu1 }
 0x116   :  { %v489_v51 = vadd.f32 %v927_v49, %v1290_v7  ;;  %v649_v52 = vadd.f32 %v975_v50, %v1290_v7  ;;  %v483_v53 = vpop.f32.mrb[27].mxu0  ;;  %v643_v54 = vpop.f32.mrb[27].mxu1 }
 0x117   :  { %v484_v55 = vadd.f32 %v1290_v7, %v483_v53  ;;  %v644_v56 = vadd.f32 %v1290_v7, %v643_v54 }
 0x118   :  { %700 = vst.msk [vmem:[%s1615_s3 + $0xd8] sm:$0xff] %vm672_vm2, %v489_v51  ;;  %732 = vst.msk [vmem:[%s1615_s3 + $0x1d8] sm:$0xff] %vm672_vm2, %v649_v52 }
 0x119   :  { %699 = vst.msk [vmem:[%s1615_s3 + $0xd0] sm:$0xff] %vm672_vm2, %v484_v55  ;;  %731 = vst.msk [vmem:[%s1615_s3 + $0x1d0] sm:$0xff] %vm672_vm2, %v644_v56  ;;  %v930_v57 = vpop.f32.mrb[28].mxu0  ;;  %v978_v58 = vpop.f32.mrb[28].mxu1 }
 0x11a   :  { %v499_v59 = vadd.f32 %v930_v57, %v1290_v7  ;;  %v659_v60 = vadd.f32 %v978_v58, %v1290_v7  ;;  %v493_v61 = vpop.f32.mrb[29].mxu0  ;;  %v653_v62 = vpop.f32.mrb[29].mxu1 }
 0x11b   :  { %v494_v63 = vadd.f32 %v1290_v7, %v493_v61  ;;  %v654_v0 = vadd.f32 %v1290_v7, %v653_v62 }
 0x11c   :  { %702 = vst.msk [vmem:[%s1615_s3 + $0xe8] sm:$0xff] %vm672_vm2, %v499_v59  ;;  %734 = vst.msk [vmem:[%s1615_s3 + $0x1e8] sm:$0xff] %vm672_vm2, %v659_v60 }
 0x11d   :  { %701 = vst.msk [vmem:[%s1615_s3 + $0xe0] sm:$0xff] %vm672_vm2, %v494_v63  ;;  %733 = vst.msk [vmem:[%s1615_s3 + $0x1e0] sm:$0xff] %vm672_vm2, %v654_v0  ;;  %v933_v1 = vpop.f32.mrb[30].mxu0  ;;  %v981_v2 = vpop.f32.mrb[30].mxu1 }
 0x11e   :  { %v509_v3 = vadd.f32 %v933_v1, %v1290_v7  ;;  %v669_v4 = vadd.f32 %v981_v2, %v1290_v7  ;;  %v503_v5 = vpop.f32.mrb[31].mxu0  ;;  %v663_v6 = vpop.f32.mrb[31].mxu1 }
 0x11f   :  { %v504_v8 = vadd.f32 %v1290_v7, %v503_v5  ;;  %v664_v9 = vadd.f32 %v1290_v7, %v663_v6 }
 0x120   :  { %704 = vst.msk [vmem:[%s1615_s3 + $0xf8] sm:$0xff] %vm672_vm2, %v509_v3  ;;  %736 = vst.msk [vmem:[%s1615_s3 + $0x1f8] sm:$0xff] %vm672_vm2, %v669_v4 }
 0x121   :  { %703 = vst.msk [vmem:[%s1615_s3 + $0xf0] sm:$0xff] %vm672_vm2, %v504_v8  ;;  %735 = vst.msk [vmem:[%s1615_s3 + $0x1f0] sm:$0xff] %vm672_vm2, %v664_v9 }

</bundles_post_ra>
